<compile_context>
chip_gen: v6e
topology: v6e:2x2x1
jax: 0.10.0
libtpu: 0.0.40
codegen_flags: <defaults>
</compile_context>

<pallas_src>
import functools

import jax
import jax.numpy as jnp
from jax.experimental import pallas as pl
from jax.experimental.pallas import tpu as pltpu


def fused_graphsage_kernel(a_ref, invdeg_ref, x_ref, w1_ref, b1_ref,
                           w2_ref, b2_ref, o_ref, h_ref, *, tile_n):
    """Fused 2-layer GraphSAGE.

    Grid: (phase, node_tile).  Phase 0: conv1 + ReLU into VMEM scratch h_ref.
    Phase 1: conv2 from the (now complete) scratch into o_ref.

    a_ref      : [tile_n, N]  bf16  raw in-edge counts for this tile's rows
    invdeg_ref : [tile_n, 1]  f32   1 / max(in_degree, 1) for this tile's rows
    x_ref      : [N, F]       bf16  all node features (grid-invariant)
    w1_ref     : [2F, H]      bf16  [[W1_self], [W1_neigh]]
    b1_ref     : [1, H]       f32
    w2_ref     : [2H, C]      bf16  [[W2_self], [W2_neigh]]
    b2_ref     : [1, C]       f32
    o_ref      : [tile_n, C]  f32   output logits for this tile
    h_ref      : [N, H]       bf16  VMEM scratch, persistent across grid steps
    """
    phase = pl.program_id(0)
    tile = pl.program_id(1)
    row0 = pl.multiple_of(tile * tile_n, tile_n)
    inv_deg = invdeg_ref[...]                            # [tile_n, 1] f32

    @pl.when(phase == 0)
    def _conv1():
        # Mean aggregation: bf16 count matmul, f32 accumulate, f32 1/deg.
        agg = jnp.dot(a_ref[...], x_ref[...],
                      preferred_element_type=jnp.float32) * inv_deg
        x_self = x_ref[pl.ds(row0, tile_n), :]           # zero-cost view
        cat = jnp.concatenate([x_self, agg.astype(jnp.bfloat16)], axis=-1)
        h = jnp.dot(cat, w1_ref[...],
                    preferred_element_type=jnp.float32) + b1_ref[...]
        h = jnp.maximum(h, 0.0)                          # ReLU
        # TODO(synk): training-mode dropout would mask h here using
        # pltpu.prng_seed / pltpu.prng_random_bits; eval mode is identity.
        h_ref[pl.ds(row0, tile_n), :] = h.astype(h_ref.dtype)

    @pl.when(phase == 1)
    def _conv2():
        agg = jnp.dot(a_ref[...], h_ref[...],
                      preferred_element_type=jnp.float32) * inv_deg
        h_self = h_ref[pl.ds(row0, tile_n), :]
        cat = jnp.concatenate([h_self, agg.astype(jnp.bfloat16)], axis=-1)
        out = jnp.dot(cat, w2_ref[...],
                      preferred_element_type=jnp.float32) + b2_ref[...]
        o_ref[...] = out.astype(o_ref.dtype)


def fused_graphsage(x, a_counts, inv_deg, w1, b1, w2, b2, *, tile_n=128):
    N, F = x.shape
    H = w1.shape[1]
    C = w2.shape[1]
    tile_n = min(tile_n, N)
    assert N % tile_n == 0, "num_nodes must be a multiple of tile_n"
    n_tiles = N // tile_n

    kernel = functools.partial(fused_graphsage_kernel, tile_n=tile_n)
    return pl.pallas_call(
        kernel,
        out_shape=jax.ShapeDtypeStruct((N, C), jnp.float32),
        grid_spec=pltpu.PrefetchScalarGridSpec(
            num_scalar_prefetch=0,
            grid=(2, n_tiles),                            # (phase, node tile)
            in_specs=[
                pl.BlockSpec((tile_n, N), lambda p, i: (i, 0)),   # adjacency rows
                pl.BlockSpec((tile_n, 1), lambda p, i: (i, 0)),   # 1/deg rows
                pl.BlockSpec((N, F),      lambda p, i: (0, 0)),   # all features
                pl.BlockSpec((2 * F, H),  lambda p, i: (0, 0)),   # [[W1s],[W1n]]
                pl.BlockSpec((1, H),      lambda p, i: (0, 0)),   # b1
                pl.BlockSpec((2 * H, C),  lambda p, i: (0, 0)),   # [[W2s],[W2n]]
                pl.BlockSpec((1, C),      lambda p, i: (0, 0)),   # b2
            ],
            out_specs=pl.BlockSpec((tile_n, C), lambda p, i: (i, 0)),
            scratch_shapes=[pltpu.VMEM((N, H), jnp.bfloat16)],    # hidden h
        ),
        compiler_params=pltpu.CompilerParams(
            # Phase 1 reads every tile written in phase 0 through the shared
            # VMEM scratch, so neither grid axis can be megacore-"parallel".
            dimension_semantics=("arbitrary", "arbitrary")),
    )(a_counts, inv_deg, x, w1, b1, w2, b2)


def build_adjacency(edge_index, num_nodes):
    """A[dst, src] = #edges src->dst (raw counts) and 1/max(in_degree, 1)."""
    src, dst = edge_index[0], edge_index[1]
    a = jnp.zeros((num_nodes, num_nodes), jnp.float32).at[dst, src].add(1.0)
    deg = a.sum(axis=1, keepdims=True)
    inv_deg = 1.0 / jnp.maximum(deg, 1.0)
    return a, inv_deg


def graphsage_forward(params, x, edge_index, *, tile_n=128):
    n = x.shape[0]
    a, inv_deg = build_adjacency(edge_index, n)
    # TODO(synk): for realistically sparse / large graphs, replace the dense
    # [N, N] adjacency matmul with a CSR gather (scalar-prefetched offsets via
    # PrefetchScalarGridSpec) and add a source-node K grid axis so the VMEM
    # footprint stays bounded (required on v7x's 64 MiB VMEM).
    w1 = jnp.concatenate([params["w1_self"], params["w1_neigh"]], axis=0)
    w2 = jnp.concatenate([params["w2_self"], params["w2_neigh"]], axis=0)
    return fused_graphsage(
        x.astype(jnp.bfloat16),
        a.astype(jnp.bfloat16),            # raw counts: exact in bf16
        inv_deg.astype(jnp.float32),       # mean normalisation stays f32
        w1.astype(jnp.bfloat16), params["b1"].astype(jnp.float32),
        w2.astype(jnp.bfloat16), params["b2"].astype(jnp.float32),
        tile_n=tile_n)


def graphsage_reference(params, x, edge_index):
    """Pure-JAX f32 reference with identical semantics (for validation)."""
    n = x.shape[0]
    a, inv_deg = build_adjacency(edge_index, n)
    agg1 = (a @ x) * inv_deg
    h = jnp.maximum(x @ params["w1_self"] + agg1 @ params["w1_neigh"]
                    + params["b1"], 0.0)
    agg2 = (a @ h) * inv_deg
    return h @ params["w2_self"] + agg2 @ params["w2_neigh"] + params["b2"]


def init_params(key, num_features, hidden_channels, num_classes):
    def glorot(k, shape):
        fan_in, fan_out = shape
        lim = (6.0 / (fan_in + fan_out)) ** 0.5
        return jax.random.uniform(k, shape, jnp.float32, -lim, lim)

    ks = jax.random.split(key, 4)
    return {
        "w1_self":  glorot(ks[0], (num_features, hidden_channels)),
        "w1_neigh": glorot(ks[1], (num_features, hidden_channels)),
        "b1":       jnp.zeros((1, hidden_channels), jnp.float32),
        "w2_self":  glorot(ks[2], (hidden_channels, num_classes)),
        "w2_neigh": glorot(ks[3], (hidden_channels, num_classes)),
        "b2":       jnp.zeros((1, num_classes), jnp.float32),
    }


if __name__ == "__main__":
    num_nodes = 256
    num_edges = 1024
    num_features = 32
    hidden_channels = 128
    num_classes = 8
    dropout_rate = 0.5          # identity in inference mode

    key = jax.random.PRNGKey(0)
    kx, ke, kp = jax.random.split(key, 3)

    x = jax.random.normal(kx, (num_nodes, num_features), jnp.float32)
    edge_index = jax.random.randint(ke, (2, num_edges), 0, num_nodes,
                                    dtype=jnp.int32)
    params = init_params(kp, num_features, hidden_channels, num_classes)

    out = jax.jit(graphsage_forward)(params, x, edge_index)
    jax.block_until_ready(out)
    assert out.shape == (num_nodes, num_classes)

    ref = graphsage_reference(params, x, edge_index)
    max_err = float(jnp.max(jnp.abs(out - ref)))
    assert max_err < 0.5, f"mismatch vs f32 reference: max abs err {max_err}"
    print("KERNEL_OK")
</pallas_src>

<mosaic_0001>
module attributes {stable_mosaic.version = 11 : i64} {
  func.func private @main(%arg0: i32) attributes {dimension_semantics = [#tpu.dimension_semantics<core_parallel>], iteration_bounds = array<i64: 2>, tpu.core_type = #tpu.core_type<sc_scalar_subcore>, window_params = []} {
    return
  }
}

module attributes {stable_mosaic.version = 11 : i64} {
  func.func private @main(%arg0: i32) attributes {dimension_semantics = [#tpu.dimension_semantics<core_parallel>], iteration_bounds = array<i64: 2>, tpu.core_type = #tpu.core_type<sc_scalar_subcore>, window_params = []} {
    return
  }
}

module attributes {stable_mosaic.version = 11 : i64} {
  func.func @fused_graphsage_kernel(%arg0: i32, %arg1: i32, %arg2: memref<128x256xbf16, #tpu.memory_space<vmem>>, %arg3: memref<128x1xf32, #tpu.memory_space<vmem>>, %arg4: memref<256x32xbf16, #tpu.memory_space<vmem>>, %arg5: memref<64x128xbf16, #tpu.memory_space<vmem>>, %arg6: memref<1x128xf32, #tpu.memory_space<vmem>>, %arg7: memref<256x8xbf16, #tpu.memory_space<vmem>>, %arg8: memref<1x8xf32, #tpu.memory_space<vmem>>, %arg9: memref<128x8xf32, #tpu.memory_space<vmem>>, %arg10: memref<256x128xbf16, #tpu.memory_space<vmem>>) attributes {dimension_semantics = [#tpu.dimension_semantics<arbitrary>, #tpu.dimension_semantics<arbitrary>], iteration_bounds = array<i64: 2, 2>, scalar_prefetch = 0 : i64, scratch_operands = 1 : i64, tpu.core_type = #tpu.core_type<tc>, window_params = [{transform_indices = @transform_0, window_bounds = array<i64: 128, 256>}, {transform_indices = @transform_1, window_bounds = array<i64: 128, 1>}, {pipeline_mode = #tpu.pipeline_mode<synchronous>, transform_indices = @transform_2, window_bounds = array<i64: 256, 32>}, {pipeline_mode = #tpu.pipeline_mode<synchronous>, transform_indices = @transform_3, window_bounds = array<i64: 64, 128>}, {pipeline_mode = #tpu.pipeline_mode<synchronous>, transform_indices = @transform_4, window_bounds = array<i64: 1, 128>}, {pipeline_mode = #tpu.pipeline_mode<synchronous>, transform_indices = @transform_5, window_bounds = array<i64: 256, 8>}, {pipeline_mode = #tpu.pipeline_mode<synchronous>, transform_indices = @transform_6, window_bounds = array<i64: 1, 8>}, {transform_indices = @transform_7, window_bounds = array<i64: 128, 8>}]} {
    %c128_i32 = arith.constant 128 : i32
    %0 = arith.muli %arg1, %c128_i32 : i32
    %1 = tpu.assume_multiple %0, 128 : i32
    %c0 = arith.constant 0 : index
    %c0_0 = arith.constant 0 : index
    %2 = vector.load %arg3[%c0, %c0_0] : memref<128x1xf32, #tpu.memory_space<vmem>>, vector<128x1xf32>
    %c0_i32 = arith.constant 0 : i32
    %3 = arith.cmpi eq, %arg0, %c0_i32 : i32
    %4 = arith.extui %3 : i1 to i32
    %c0_i32_1 = arith.constant 0 : i32
    %5 = arith.cmpi ne, %4, %c0_i32_1 : i32
    scf.if %5 {
      %c0_3 = arith.constant 0 : index
      %c0_4 = arith.constant 0 : index
      %9 = vector.load %arg2[%c0_3, %c0_4] : memref<128x256xbf16, #tpu.memory_space<vmem>>, vector<128x256xbf16>
      %c0_5 = arith.constant 0 : index
      %c0_6 = arith.constant 0 : index
      %10 = vector.load %arg4[%c0_5, %c0_6] : memref<256x32xbf16, #tpu.memory_space<vmem>>, vector<256x32xbf16>
      %cst = arith.constant dense<0.000000e+00> : vector<128x32xf32>
      %11 = tpu.matmul %9, %10, %cst {dimension_numbers = #tpu.dot_dimension_numbers<[1], [0], [0], [1], [0, 0, 1, 1], [], []>} : vector<128x256xbf16>, vector<256x32xbf16>, vector<128x32xf32> -> vector<128x32xf32>
      %12 = vector.broadcast %2 : vector<128x1xf32> to vector<128x32xf32>
      %13 = arith.mulf %11, %12 : vector<128x32xf32>
      %14 = arith.index_cast %1 : i32 to index
      %c0_7 = arith.constant 0 : index
      %15 = vector.load %arg4[%14, %c0_7] : memref<256x32xbf16, #tpu.memory_space<vmem>>, vector<128x32xbf16>
      %16 = arith.truncf %13 : vector<128x32xf32> to vector<128x32xbf16>
      %17 = tpu.concatenate %15, %16 in 1 : vector<128x32xbf16>, vector<128x32xbf16> -> vector<128x64xbf16>
      %c0_8 = arith.constant 0 : index
      %c0_9 = arith.constant 0 : index
      %18 = vector.load %arg5[%c0_8, %c0_9] : memref<64x128xbf16, #tpu.memory_space<vmem>>, vector<64x128xbf16>
      %cst_10 = arith.constant dense<0.000000e+00> : vector<128x128xf32>
      %19 = tpu.matmul %17, %18, %cst_10 {dimension_numbers = #tpu.dot_dimension_numbers<[1], [0], [0], [1], [0, 0, 1, 1], [], []>} : vector<128x64xbf16>, vector<64x128xbf16>, vector<128x128xf32> -> vector<128x128xf32>
      %c0_11 = arith.constant 0 : index
      %c0_12 = arith.constant 0 : index
      %20 = vector.load %arg6[%c0_11, %c0_12] : memref<1x128xf32, #tpu.memory_space<vmem>>, vector<1x128xf32>
      %21 = vector.broadcast %20 : vector<1x128xf32> to vector<128x128xf32>
      %22 = arith.addf %19, %21 : vector<128x128xf32>
      %cst_13 = arith.constant 0.000000e+00 : f32
      %23 = vector.broadcast %cst_13 : f32 to vector<128x128xf32>
      %24 = arith.maximumf %22, %23 : vector<128x128xf32>
      %25 = arith.truncf %24 : vector<128x128xf32> to vector<128x128xbf16>
      %26 = arith.index_cast %1 : i32 to index
      %c0_14 = arith.constant 0 : index
      %27 = vector.load %arg10[%26, %c0_14] : memref<256x128xbf16, #tpu.memory_space<vmem>>, vector<128x128xbf16>
      tpu.vector_store %arg10[%26, %c0_14], %25 {strides = array<i32>} : memref<256x128xbf16, #tpu.memory_space<vmem>>, vector<128x128xbf16>,
    } else {
    }
    %c1_i32 = arith.constant 1 : i32
    %6 = arith.cmpi eq, %arg0, %c1_i32 : i32
    %7 = arith.extui %6 : i1 to i32
    %c0_i32_2 = arith.constant 0 : i32
    %8 = arith.cmpi ne, %7, %c0_i32_2 : i32
    scf.if %8 {
      %c0_3 = arith.constant 0 : index
      %c0_4 = arith.constant 0 : index
      %9 = vector.load %arg2[%c0_3, %c0_4] : memref<128x256xbf16, #tpu.memory_space<vmem>>, vector<128x256xbf16>
      %c0_5 = arith.constant 0 : index
      %c0_6 = arith.constant 0 : index
      %10 = vector.load %arg10[%c0_5, %c0_6] : memref<256x128xbf16, #tpu.memory_space<vmem>>, vector<256x128xbf16>
      %cst = arith.constant dense<0.000000e+00> : vector<128x128xf32>
      %11 = tpu.matmul %9, %10, %cst {dimension_numbers = #tpu.dot_dimension_numbers<[1], [0], [0], [1], [0, 0, 1, 1], [], []>} : vector<128x256xbf16>, vector<256x128xbf16>, vector<128x128xf32> -> vector<128x128xf32>
      %12 = vector.broadcast %2 : vector<128x1xf32> to vector<128x128xf32>
      %13 = arith.mulf %11, %12 : vector<128x128xf32>
      %14 = arith.index_cast %1 : i32 to index
      %c0_7 = arith.constant 0 : index
      %15 = vector.load %arg10[%14, %c0_7] : memref<256x128xbf16, #tpu.memory_space<vmem>>, vector<128x128xbf16>
      %16 = arith.truncf %13 : vector<128x128xf32> to vector<128x128xbf16>
      %17 = tpu.concatenate %15, %16 in 1 : vector<128x128xbf16>, vector<128x128xbf16> -> vector<128x256xbf16>
      %c0_8 = arith.constant 0 : index
      %c0_9 = arith.constant 0 : index
      %18 = vector.load %arg7[%c0_8, %c0_9] : memref<256x8xbf16, #tpu.memory_space<vmem>>, vector<256x8xbf16>
      %cst_10 = arith.constant dense<0.000000e+00> : vector<128x8xf32>
      %19 = tpu.matmul %17, %18, %cst_10 {dimension_numbers = #tpu.dot_dimension_numbers<[1], [0], [0], [1], [0, 0, 1, 1], [], []>} : vector<128x256xbf16>, vector<256x8xbf16>, vector<128x8xf32> -> vector<128x8xf32>
      %c0_11 = arith.constant 0 : index
      %c0_12 = arith.constant 0 : index
      %20 = vector.load %arg8[%c0_11, %c0_12] : memref<1x8xf32, #tpu.memory_space<vmem>>, vector<1x8xf32>
      %21 = vector.broadcast %20 : vector<1x8xf32> to vector<128x8xf32>
      %22 = arith.addf %19, %21 : vector<128x8xf32>
      %c0_13 = arith.constant 0 : index
      %c0_14 = arith.constant 0 : index
      %23 = vector.load %arg9[%c0_13, %c0_14] : memref<128x8xf32, #tpu.memory_space<vmem>>, vector<128x8xf32>
      tpu.vector_store %arg9[%c0_13, %c0_14], %22 {strides = array<i32>} : memref<128x8xf32, #tpu.memory_space<vmem>>, vector<128x8xf32>,
    } else {
    }
    return
  }
  func.func @transform_0(%arg0: i32, %arg1: i32) -> (i32, i32) {
    %c0_i32 = arith.constant 0 : i32
    %c0_i32_0 = arith.constant 0 : i32
    return %arg1, %c0_i32 : i32, i32
  }
  func.func @transform_1(%arg0: i32, %arg1: i32) -> (i32, i32) {
    %c0_i32 = arith.constant 0 : i32
    %c0_i32_0 = arith.constant 0 : i32
    return %arg1, %c0_i32 : i32, i32
  }
  func.func @transform_2(%arg0: i32, %arg1: i32) -> (i32, i32) {
    %c0_i32 = arith.constant 0 : i32
    %c0_i32_0 = arith.constant 0 : i32
    %c0_i32_1 = arith.constant 0 : i32
    return %c0_i32, %c0_i32_0 : i32, i32
  }
  func.func @transform_3(%arg0: i32, %arg1: i32) -> (i32, i32) {
    %c0_i32 = arith.constant 0 : i32
    %c0_i32_0 = arith.constant 0 : i32
    %c0_i32_1 = arith.constant 0 : i32
    return %c0_i32, %c0_i32_0 : i32, i32
  }
  func.func @transform_4(%arg0: i32, %arg1: i32) -> (i32, i32) {
    %c0_i32 = arith.constant 0 : i32
    %c0_i32_0 = arith.constant 0 : i32
    %c0_i32_1 = arith.constant 0 : i32
    return %c0_i32, %c0_i32_0 : i32, i32
  }
  func.func @transform_5(%arg0: i32, %arg1: i32) -> (i32, i32) {
    %c0_i32 = arith.constant 0 : i32
    %c0_i32_0 = arith.constant 0 : i32
    %c0_i32_1 = arith.constant 0 : i32
    return %c0_i32, %c0_i32_0 : i32, i32
  }
  func.func @transform_6(%arg0: i32, %arg1: i32) -> (i32, i32) {
    %c0_i32 = arith.constant 0 : i32
    %c0_i32_0 = arith.constant 0 : i32
    %c0_i32_1 = arith.constant 0 : i32
    return %c0_i32, %c0_i32_0 : i32, i32
  }
  func.func @transform_7(%arg0: i32, %arg1: i32) -> (i32, i32) {
    %c0_i32 = arith.constant 0 : i32
    %c0_i32_0 = arith.constant 0 : i32
    return %arg1, %c0_i32 : i32, i32
  }
}

</mosaic_0001>

<bundles_post_ra>
// kernel: graphsage_forward.1
= control target key start
LH: loop header
LB: loop body
LE: loop exit
PB: predicated region body
PF: predicated region fallthrough
CT: control target
= control target key end

     0   :  { %s2658_s24 = smov 0   ;;  %s2660_s25 = smov 0   ;;  %s3052_s0 = inlined_call_operand.vmem [shape: bf16[256,256], index: 0, kind: input, shape index: {}]   ;;  %s3053_s1 = inlined_call_operand.vmem [shape: f32[256,1], index: 1, kind: input, shape index: {}]   ;;  %s3054_s2 = inlined_call_operand.vmem [shape: bf16[256,32], index: 2, kind: input, shape index: {}]   ;;  %s3055_s3 = inlined_call_operand.vmem [shape: bf16[64,128], index: 3, kind: input, shape index: {}]   ;;  %s3056_s4 = inlined_call_operand.vmem [shape: f32[1,128], index: 4, kind: input, shape index: {}]   ;;  %s3057_s5 = inlined_call_operand.vmem [shape: bf16[256,8], index: 5, kind: input, shape index: {}]   ;;  %s3058_s6 = inlined_call_operand.vmem [shape: f32[1,8], index: 6, kind: input, shape index: {}]   ;;  %s3059_s7 = inlined_call_operand.vmem [shape: f32[256,8], index: 7, kind: output, shape index: {}]  }
   0x1   :  { %s2662_s26 = smov 0   ;;  %s2664_s27 = smov 0  }
   0x2   :  { %s2666_s28 = smov 0  }
   0x3 LB: > { %s26_s29 = sadd.s32 1, %s2605_s26  ;;  %s29_s30 = sadd.s32 1, %s2609_s27  ;;  %s2613_s28 = sphi %s2666_s28, %s17_s28   ;;  %s2609_s27 = sphi %s2664_s27, %s3063_s27   ;;  %s2605_s26 = sphi %s2662_s26, %s3062_s26   ;;  %s2601_s25 = sphi %s2660_s25, %s3061_s25   ;;  %s2597_s24 = sphi %s2658_s24, %s3060_s24  }
   0x4   : > { %p27_p0 = scmp.ge.s32.totalorder %s26_s29, 2  ;;  %p1962_p1 = scmp.ge.s32.totalorder %s2613_s28, 1 }
   0x5   : > { %p262_p2 = scmp.lt.s32.totalorder %s2613_s28, 5 }
   0x6   : > { %s3065_s29 = smov (%p27_p0, %s26_s29), 0  ;;  %s3067_s30 = smov (!%p27_p0, %s29_s30), %s2609_s27 }
   0x7   : > { %p263_p3 = pnand %p1962_p1, %p262_p2  ;;  %p31_p4 = scmp.ge.s32.totalorder %s3067_s30, 2 }
   0x8   : > { %s1963_s8 = sshll.u32 (!%p263_p3), %s2597_s24, 4  ;;  %s1970_s9 = sshll.u32 (!%p263_p3), %s2597_s24, 7 }
   0x9   : > { %s3069_s30 = smov (%p31_p4, %s3067_s30), 0  ;;  %266 = sbr.rel (%p263_p3) target bundleno = 1139 (0x473), region = 48 }
   0xa   : > { %p301_p5 = scmp.lt.s32.totalorder (!%p263_p3), %s1963_s8, 31  ;;  %p1971_p6 = scmp.ne.s32.totalorder (!%p263_p3), %s2601_s25, 0 }
   0xe   : > { %s3071_s8 = smov (!%p301_p5, %s1963_s8), 31  ;;  %s2616_s11 = smov (!%p1971_p6), 32  }
   0xf   : > { %s2104_s10 = sshll.u32 %s3071_s8, 3 }
  0x10   : > { %s2697_s13 = scalar_lea.vmem %s3052_s0, %s2104_s10  ;;  %s311_s16 = scalar_lea.vmem %s3053_s1, %s2104_s10 }
  0x11   : > { %s2705_s19 = scalar_lea.vmem %s3059_s7, %s2104_s10  ;;  %v2707_v0 = vld [vmem:[%s311_s16] sm:$0xff]  ;;  %v2709_v1 = vld [vmem:[%s311_s16 + $0x8] sm:$0xff]  ;;  %v2711_v2 = vld [vmem:[%s311_s16 + $0x10] sm:$0xff] }
  0x12   : > { %v2713_v3 = vld [vmem:[%s311_s16 + $0x18] sm:$0xff]  ;;  %v2715_v4 = vld [vmem:[%s311_s16 + $0x20] sm:$0xff]  ;;  %v2717_v5 = vld [vmem:[%s311_s16 + $0x28] sm:$0xff]  ;;  %340 = sbr.rel (%p1971_p6) target bundleno = 632 (0x278), region = 52 }
  0x13   : > { %v2719_v6 = vld [vmem:[%s311_s16 + $0x30] sm:$0xff]  ;;  %v2721_v7 = vld [vmem:[%s311_s16 + $0x38] sm:$0xff]  ;;  %v2723_v8 = vld [vmem:[%s311_s16 + $0x40] sm:$0xff] }
  0x14   : > { %v2725_v9 = vld [vmem:[%s311_s16 + $0x48] sm:$0xff]  ;;  %v2727_v10 = vld [vmem:[%s311_s16 + $0x50] sm:$0xff]  ;;  %v2729_v11 = vld [vmem:[%s311_s16 + $0x58] sm:$0xff] }
  0x15   : > { %v2731_v12 = vld [vmem:[%s311_s16 + $0x60] sm:$0xff]  ;;  %v2733_v13 = vld [vmem:[%s311_s16 + $0x68] sm:$0xff]  ;;  %v2735_v14 = vld [vmem:[%s311_s16 + $0x70] sm:$0xff] }
  0x16   : > { %v2737_v15 = vld [vmem:[%s311_s16 + $0x78] sm:$0xff]  ;;  %s2828_s16 = sshra.s32 (!%p1971_p6), %s1970_s9, 3 }
  0x17   : > { %v2457_v16 = vld [vmem:[%s3054_s2 + $0x78] sm:$0xff]   ;;  %v2615_v18 = vmov 0   ;;  %v2459_v19 = vld [vmem:[%s3054_s2 + $0x70] sm:$0xff]   ;;  %v2461_v21 = vld [vmem:[%s3054_s2 + $0x68] sm:$0xff]   ;;  %s2004_s17 = sshll.u32 %s2828_s16, 2  ;;  %vm850_vm0 = vcmask 261120  }
  0x18   : > { %v2458_v17 = vld [vmem:[%s3054_s2 + $0x38] sm:$0xff]   ;;  %2456 = vset.pattern.permute.xlu1 %v2615_v18  ;;  %2455 = vset.pattern.permute.xlu0 %v2615_v18  ;;  %v2460_v20 = vld [vmem:[%s3054_s2 + $0x30] sm:$0xff]   ;;  %v2462_v22 = vld [vmem:[%s3054_s2 + $0x28] sm:$0xff]   ;;  %s2836_s21 = scalar_lea.vmem %s3054_s2, %s2004_s17  ;;  %vm914_vm1 = vcmask 523264   ;;  %s2881_s15 = scalar_lea.vmem [#allocation2], %s2004_s17 }
  0x19   : > { %2168 = vmatprep.subr.bf16.mxu0 %v2457_v16  ;;  %2396 = vmatprep.subr.bf16.mxu1 %v2457_v16  ;;  %v2463_v23 = vld [vmem:[%s3054_s2 + $0x60] sm:$0xff]   ;;  %v2465_v25 = vld [vmem:[%s3054_s2 + $0x58] sm:$0xff]   ;;  %v2467_v27 = vld [vmem:[%s3054_s2 + $0x50] sm:$0xff]  }
  0x1a   : > { %2169 = vmatpush3.bf16.msra.mxu0 %v2458_v17  ;;  %2404 = vmatpush3.bf16.msra.mxu1 %v2458_v17  ;;  %v2464_v24 = vld [vmem:[%s3054_s2 + $0x20] sm:$0xff]   ;;  %v2466_v26 = vld [vmem:[%s3054_s2 + $0x18] sm:$0xff]   ;;  %v2468_v29 = vld [vmem:[%s3054_s2 + $0x10] sm:$0xff]  }
  0x1b   : > { %2170 = vmatprep.subr.bf16.mxu0 %v2459_v19  ;;  %2397 = vmatprep.subr.bf16.mxu1 %v2459_v19  ;;  %v2475_v28 = vld [vmem:[%s2697_s13 + $0x4] ss:$8 sps:$4 sm:$0xff]   ;;  %v2473_v35 = vld [vmem:[%s2697_s13] ss:$8 sps:$4 sm:$0xff]   ;;  %v2476_v37 = vld [vmem:[%s2697_s13 + $0x14] ss:$8 sps:$4 sm:$0xff]  }
  0x1c   : > { %674 = vperm.xlu1 %2456, %v2711_v2   ;;  %664 = vperm.xlu0 %2455, %v2707_v0   ;;  %v2481_v30 = vld [vmem:[%s2697_s13 + $0x64] ss:$8 sps:$4 sm:$0xff]   ;;  %v2479_v36 = vld [vmem:[%s2697_s13 + $0x60] ss:$8 sps:$4 sm:$0xff]   ;;  %v2485_v38 = vld [vmem:[%s2697_s13 + $0x74] ss:$8 sps:$4 sm:$0xff]  }
  0x1d   : > { %v2469_v31 = vld [vmem:[%s3054_s2 + $0x48] sm:$0xff]   ;;  %597 = vmatprep.mubr.bf16.mxu0 %v2475_v28  ;;  %645 = vmatprep.mubr.bf16.mxu1 %v2481_v30  ;;  %v2471_v33 = vld [vmem:[%s3054_s2 + $0x40] sm:$0xff]   ;;  %v2478_v39 = vld [vmem:[%s2697_s13 + $0x10] ss:$8 sps:$4 sm:$0xff]  }
  0x1e   : > { %2171 = vmatpush3.bf16.msra.mxu0 %v2460_v20  ;;  %2405 = vmatpush3.bf16.msra.mxu1 %v2460_v20  ;;  %v2470_v32 = vld [vmem:[%s3054_s2 + $0x8] sm:$0xff]   ;;  %v2472_v34 = vld [vmem:[%s3054_s2] sm:$0xff]   ;;  %v2487_v40 = vld [vmem:[%s2697_s13 + $0x70] ss:$8 sps:$4 sm:$0xff]  }
  0x1f   : > { %2172 = vmatprep.subr.bf16.mxu0 %v2461_v21  ;;  %2398 = vmatprep.subr.bf16.mxu1 %v2461_v21  ;;  %v2482_v41 = vld [vmem:[%s2697_s13 + $0x24] ss:$8 sps:$4 sm:$0xff]   ;;  %v2484_v42 = vld [vmem:[%s2697_s13 + $0x20] ss:$8 sps:$4 sm:$0xff]   ;;  %v2488_v43 = vld [vmem:[%s2697_s13 + $0x34] ss:$8 sps:$4 sm:$0xff]  }
  0x20   : > { %679 = vperm.xlu1 %2456, %v2713_v3   ;;  %669 = vperm.xlu0 %2455, %v2709_v1   ;;  %v2490_v44 = vld [vmem:[%s2697_s13 + $0x30] ss:$8 sps:$4 sm:$0xff]   ;;  %v2491_v45 = vld [vmem:[%s2697_s13 + $0x44] ss:$8 sps:$4 sm:$0xff]   ;;  %v2493_v46 = vld [vmem:[%s2697_s13 + $0x40] ss:$8 sps:$4 sm:$0xff]  }
  0x21   : > { %v2494_v47 = vld [vmem:[%s2697_s13 + $0x54] ss:$8 sps:$4 sm:$0xff]   ;;  %v2496_v48 = vld [vmem:[%s2697_s13 + $0x50] ss:$8 sps:$4 sm:$0xff]   ;;  %v2500_v51 = vld [vmem:[%s3055_s3 + $0x8] sm:$0xff]  }
  0x22   : > { %2173 = vmatpush3.bf16.msra.mxu0 %v2462_v22  ;;  %2406 = vmatpush3.bf16.msra.mxu1 %v2462_v22  ;;  %v2497_v49 = vld [vmem:[%s3055_s3 + $0x18] sm:$0xff]   ;;  %v2498_v50 = vld [vmem:[%s3055_s3 + $0x10] sm:$0xff]   ;;  %v2501_v53 = vld [vmem:[%s3055_s3] sm:$0xff]  }
  0x23   : > { %2174 = vmatprep.subr.bf16.mxu0 %v2463_v23  ;;  %2399 = vmatprep.subr.bf16.mxu1 %v2463_v23 }
  0x24   : > { %689 = vperm.xlu1 %2456, %v2717_v5   ;;  %684 = vperm.xlu0 %2455, %v2715_v4  }
  0x26   : > { %2175 = vmatpush3.bf16.msra.mxu0 %v2464_v24  ;;  %2407 = vmatpush3.bf16.msra.mxu1 %v2464_v24 }
  0x27   : > { %2176 = vmatprep.subr.bf16.mxu0 %v2465_v25  ;;  %2400 = vmatprep.subr.bf16.mxu1 %v2465_v25 }
  0x28   : > { %699 = vperm.xlu1 %2456, %v2721_v7   ;;  %694 = vperm.xlu0 %2455, %v2719_v6  }
  0x2a   : > { %2177 = vmatpush3.bf16.msra.mxu0 %v2466_v26  ;;  %2408 = vmatpush3.bf16.msra.mxu1 %v2466_v26 }
  0x2b   : > { %2178 = vmatprep.subr.bf16.mxu0 %v2467_v27  ;;  %2401 = vmatprep.subr.bf16.mxu1 %v2467_v27 }
  0x2c   : > { %709 = vperm.xlu1 %2456, %v2725_v9   ;;  %704 = vperm.xlu0 %2455, %v2723_v8  }
  0x2e   : > { %2179 = vmatpush3.bf16.msra.mxu0 %v2468_v29  ;;  %2409 = vmatpush3.bf16.msra.mxu1 %v2468_v29 }
  0x2f   : > { %2180 = vmatprep.subr.bf16.mxu0 %v2469_v31  ;;  %2402 = vmatprep.subr.bf16.mxu1 %v2469_v31 }
  0x30   : > { %719 = vperm.xlu1 %2456, %v2729_v11   ;;  %714 = vperm.xlu0 %2455, %v2727_v10  }
  0x32   : > { %2181 = vmatpush3.bf16.msra.mxu0 %v2470_v32  ;;  %2410 = vmatpush3.bf16.msra.mxu1 %v2470_v32 }
  0x33   : > { %2182 = vmatprep.subr.bf16.mxu0 %v2471_v33  ;;  %2403 = vmatprep.subr.bf16.mxu1 %v2471_v33 }
  0x34   : > { %729 = vperm.xlu1 %2456, %v2733_v13   ;;  %724 = vperm.xlu0 %2455, %v2731_v12  }
  0x36   : > { %2183 = vmatpush3.bf16.msra.mxu0 %v2472_v34  ;;  %2411 = vmatpush3.bf16.msra.mxu1 %v2472_v34 }
  0x37   : > { %2372 = vmatprep.subr.bf16.mxu1 %v2497_v49 }
  0x38   : > { %739 = vperm.xlu1 %2456, %v2737_v15   ;;  %734 = vperm.xlu0 %2455, %v2735_v14  }
  0x39   : > { %598 = vmatmul.mubr.bf16.vlgmr.msra.gmra.mxu0 %v2473_v35  ;;  %646 = vmatmul.mubr.bf16.vlgmr.msra.gmra.mxu1 %v2479_v36 }
  0x3a   : > { %605 = vmatprep.mubr.bf16.mxu0 %v2476_v37  ;;  %653 = vmatprep.mubr.bf16.mxu1 %v2485_v38 }
  0x3b   : > { %2373 = vmatpush3.bf16.msra.mxu1 %v2497_v49 }
  0x3c   : > { %2374 = vmatprep.subr.bf16.mxu1 %v2498_v50 }
  0x3f   : > { %2375 = vmatpush3.bf16.msra.mxu1 %v2498_v50 }
  0x40   : > { %2376 = vmatprep.subr.bf16.mxu1 %v2500_v51 }
  0x41   : > { %606 = vmatmul.mubr.bf16.gmra.mxu0 %v2478_v39  ;;  %654 = vmatmul.mubr.bf16.gmra.mxu1 %v2487_v40 }
  0x42   : > { %613 = vmatprep.mubr.bf16.mxu0 %v2482_v41 }
  0x43   : > { %2377 = vmatpush3.bf16.msra.mxu1 %v2500_v51 }
  0x44   : > { %2378 = vmatprep.subr.bf16.mxu1 %v2501_v53 }
  0x47   : > { %2379 = vmatpush3.bf16.msra.mxu1 %v2501_v53 }
  0x49   : > { %614 = vmatmul.mubr.bf16.gmra.mxu0 %v2484_v42 }
  0x4a   : > { %621 = vmatprep.mubr.bf16.mxu0 %v2488_v43 }
  0x51   : > { %622 = vmatmul.mubr.bf16.gmra.mxu0 %v2490_v44 }
  0x52   : > { %629 = vmatprep.mubr.bf16.mxu0 %v2491_v45 }
  0x59   : > { %630 = vmatmul.mubr.bf16.gmra.mxu0 %v2493_v46 }
  0x5a   : > { %637 = vmatprep.mubr.bf16.mxu0 %v2494_v47 }
  0x61   : > { %638 = vmatmul.mubr.bf16.gmra.mxu0 %v2496_v48 }
  0x97   : > { %v665_v54 = vpop.permute.xlu0 %664  ;;  %v675_v57 = vpop.permute.xlu1 %674 }
  0x9b   : > { %v670_v61 = vpop.permute.xlu0 %669  ;;  %v680_v18 = vpop.permute.xlu1 %679 }
  0x9f   : > { %v690_v26 = vpop.permute.xlu1 %689  ;;  %v685_v27 = vpop.permute.xlu0 %684 }
  0xa3   : > { %v700_v36 = vpop.permute.xlu1 %699  ;;  %v695_v37 = vpop.permute.xlu0 %694 }
  0xa7   : > { %v710_v47 = vpop.permute.xlu1 %709  ;;  %v705_v48 = vpop.permute.xlu0 %704 }
  0xf9   : > { %v2184_v52 = vpop.f32.mrf.mxu0  ;;  %v2220_v24 = vpop.f32.mrf.mxu1 }
  0xfb   : > { %v2185_v55 = vpop.f32.mrf.mxu0  ;;  %v2221_v32 = vpop.f32.mrf.mxu1 }
  0xfc   : > { %v2186_v58 = vadd.f32 %v2185_v55, %v2184_v52 }
  0xfd   : > { %v2187_v56 = vpop.f32.mrf.mxu0  ;;  %v2223_v39 = vpop.f32.mrf.mxu1 }
  0xfe   : > { %v742_v63 = vmul.f32 %v2186_v58, %v665_v54  ;;  %v715_v58 = vpop.permute.xlu0 %714 }
  0xff   : > { %v2188_v59 = vpop.f32.mrf.mxu0  ;;  %v2224_v45 = vpop.f32.mrf.mxu1 }
 0x100   : > { %v2189_v60 = vadd.f32 %v2188_v59, %v2187_v56 }
 0x101   : > { %v2190_v62 = vpop.f32.mrf.mxu0  ;;  %v2226_v52 = vpop.f32.mrf.mxu1 }
 0x102   : > { %v743_v16 = vmul.f32 %v2189_v60, %v670_v61 }
 0x103   : > { %v2191_v17 = vpop.f32.mrf.mxu0  ;;  %v2227_v60 = vpop.f32.mrf.mxu1 }
 0x104   : > { %v778_v19 = vpack.c.bf16 %v743_v16, %v742_v63  ;;  %v2192_v21 = vadd.f32 %v2191_v17, %v2190_v62  ;;  %v2222_v16 = vadd.f32 %v2221_v32, %v2220_v24  ;;  %v2225_v17 = vadd.f32 %v2224_v45, %v2223_v39  ;;  %v2499_v45 = vld [vmem:[%s2836_s21] sm:$0xff]  }
 0x105   : > { %v2193_v20 = vpop.f32.mrf.mxu0  ;;  %v2228_v24 = vadd.f32 %v2227_v60, %v2226_v52  ;;  %v2507_v60 = vld [vmem:[%s2836_s21 + $0x28] sm:$0xff]  }
 0x106   : > { %834 = vrot.lane.b32.xlu0 %v778_v19, %s2616_s11  ;;  %v744_v28 = vmul.f32 %v2192_v21, %v675_v57  ;;  %v720_v57 = vpop.permute.xlu1 %719  ;;  %v2229_v19 = vpop.f32.mrf.mxu1 }
 0x107   : > { %v2194_v22 = vpop.f32.mrf.mxu0 }
 0x108   : > { %v2195_v23 = vadd.f32 %v2194_v22, %v2193_v20 }
 0x109   : > { %v2196_v25 = vpop.f32.mrf.mxu0 }
 0x10a   : > { %v745_v29 = vmul.f32 %v2195_v23, %v680_v18  ;;  %v730_v21 = vpop.permute.xlu1 %729 }
 0x10b   : > { %v2197_v30 = vpop.f32.mrf.mxu0 }
 0x10c   : > { %v779_v31 = vpack.c.bf16 %v745_v29, %v744_v28  ;;  %v2198_v34 = vadd.f32 %v2197_v30, %v2196_v25  ;;  %v725_v25 = vpop.permute.xlu0 %724  ;;  %v2230_v30 = vpop.f32.mrf.mxu1 }
 0x10d   : > { %v2199_v33 = vpop.f32.mrf.mxu0  ;;  %v754_v28 = vmul.f32 %v2222_v16, %v725_v25 }
 0x10e   : > { %836 = vrot.lane.b32.xlu1 %v779_v31, %s2616_s11  ;;  %v746_v41 = vmul.f32 %v2198_v34, %v685_v27  ;;  %v755_v27 = vmul.f32 %v2225_v17, %v730_v21 }
 0x10f   : > { %v2200_v35 = vpop.f32.mrf.mxu0 }
 0x110   : > { %v2201_v38 = vadd.f32 %v2200_v35, %v2199_v33  ;;  %v784_v32 = vpack.c.bf16 %v755_v27, %v754_v28  ;;  %v2231_v35 = vadd.f32 %v2230_v30, %v2229_v19 }
 0x111   : > { %v2202_v40 = vpop.f32.mrf.mxu0 }
 0x112   : > { %v747_v42 = vmul.f32 %v2201_v38, %v690_v26  ;;  %v735_v38 = vpop.permute.xlu0 %734 }
 0x113   : > { %v2203_v43 = vpop.f32.mrf.mxu0 }
 0x114   : > { %v780_v44 = vpack.c.bf16 %v747_v42, %v746_v41  ;;  %v2204_v49 = vadd.f32 %v2203_v43, %v2202_v40  ;;  %v756_v42 = vmul.f32 %v2228_v24, %v735_v38 }
 0x115   : > { %v2205_v46 = vpop.f32.mrf.mxu0 }
 0x116   : > { %838 = vrot.lane.b32.xlu0 %v780_v44, %s2616_s11  ;;  %v748_v54 = vmul.f32 %v2204_v49, %v695_v37  ;;  %v740_v37 = vpop.permute.xlu1 %739 }
 0x117   : > { %v2206_v50 = vpop.f32.mrf.mxu0  ;;  %v757_v41 = vmul.f32 %v2231_v35, %v740_v37 }
 0x118   : > { %v2207_v51 = vadd.f32 %v2206_v50, %v2205_v46 }
 0x119   : > { %v2208_v53 = vpop.f32.mrf.mxu0  ;;  %v785_v44 = vpack.c.bf16 %v757_v41, %v756_v42 }
 0x11a   : > { %v749_v55 = vmul.f32 %v2207_v51, %v700_v36  ;;  %v2503_v51 = vld [vmem:[%s2836_s21 + $0x10] sm:$0xff]  }
 0x11b   : > { %v2209_v56 = vpop.f32.mrf.mxu0 }
 0x11c   : > { %v781_v59 = vpack.c.bf16 %v749_v55, %v748_v54  ;;  %v2210_v62 = vadd.f32 %v2209_v56, %v2208_v53  ;;  %v2504_v54 = vld [vmem:[%s2836_s21 + $0x18] sm:$0xff]  }
 0x11d   : > { %v2211_v61 = vpop.f32.mrf.mxu0 }
 0x11e   : > { %840 = vrot.lane.b32.xlu1 %v781_v59, %s2616_s11  ;;  %v750_v22 = vmul.f32 %v2210_v62, %v705_v48  ;;  %v2502_v48 = vld [vmem:[%s2836_s21 + $0x8] sm:$0xff]  }
 0x11f   : > { %v2212_v63 = vpop.f32.mrf.mxu0 }
 0x120   : > { %v2213_v18 = vadd.f32 %v2212_v63, %v2211_v61  ;;  %v2506_v61 = vld [vmem:[%s2836_s21 + $0x30] sm:$0xff]  }
 0x121   : > { %v2214_v20 = vpop.f32.mrf.mxu0 }
 0x122   : > { %v751_v23 = vmul.f32 %v2213_v18, %v710_v47  ;;  %v2508_v18 = vld [vmem:[%s2836_s21 + $0x38] sm:$0xff]  }
 0x123   : > { %v2215_v26 = vpop.f32.mrf.mxu0 }
 0x124   : > { %v782_v29 = vpack.c.bf16 %v751_v23, %v750_v22  ;;  %v2216_v33 = vadd.f32 %v2215_v26, %v2214_v20  ;;  %v2013_v22 = vld [vmem:[%s3056_s4] ss:$0 sm:$0xff] }
 0x125   : > { %v2217_v31 = vpop.f32.mrf.mxu0 }
 0x126   : > { %842 = vrot.lane.b32.xlu0 %v782_v29, %s2616_s11  ;;  %v752_v39 = vmul.f32 %v2216_v33, %v715_v58 }
 0x127   : > { %v2218_v34 = vpop.f32.mrf.mxu0 }
 0x128   : > { %v2219_v36 = vadd.f32 %v2218_v34, %v2217_v31 }
 0x12a   : > { %v753_v40 = vmul.f32 %v2219_v36, %v720_v57  ;;  %846 = vrot.lane.b32.xlu0 %v784_v32, %s2616_s11  ;;  %v2505_v57 = vld [vmem:[%s2836_s21 + $0x20] sm:$0xff]  }
 0x12c   : > { %v783_v43 = vpack.c.bf16 %v753_v40, %v752_v39 }
 0x12e   : > { %844 = vrot.lane.b32.xlu1 %v783_v43, %s2616_s11 }
 0x132   : > { %848 = vrot.lane.b32.xlu1 %v785_v44, %s2616_s11 }
 0x178   : > { %v835_v46 = vpop.permute.xlu0 %834 }
 0x179   : > { %v853_v47 = vsel %vm850_vm0, %v2499_v45, %v835_v46 }
 0x17a   : > { %2380 = vmatprep.mubr.msk.bf16.mxu1 %vm914_vm1, %v853_v47 }
 0x180   : > { %v837_v49 = vpop.permute.xlu1 %836 }
 0x181   : > { %v856_v50 = vsel %vm850_vm0, %v2502_v48, %v837_v49 }
 0x182   : > { %2381 = vmatmul.mubr.msk.bf16.vlgmr.msra.gmra.mxu1 %vm914_vm1, %v856_v50 }
 0x188   : > { %v839_v52 = vpop.permute.xlu0 %838 }
 0x189   : > { %v859_v53 = vsel %vm850_vm0, %v2503_v51, %v839_v52 }
 0x18a   : > { %2384 = vmatprep.mubr.msk.bf16.mxu1 %vm914_vm1, %v859_v53 }
 0x190   : > { %v841_v55 = vpop.permute.xlu1 %840 }
 0x191   : > { %v862_v56 = vsel %vm850_vm0, %v2504_v54, %v841_v55 }
 0x192   : > { %2385 = vmatmul.mubr.msk.bf16.gmra.mxu1 %vm914_vm1, %v862_v56 }
 0x198   : > { %v843_v58 = vpop.permute.xlu0 %842 }
 0x199   : > { %v865_v59 = vsel %vm850_vm0, %v2505_v57, %v843_v58 }
 0x19a   : > { %2388 = vmatprep.mubr.msk.bf16.mxu1 %vm914_vm1, %v865_v59 }
 0x19c   : > { %v847_v62 = vpop.permute.xlu0 %846 }
 0x19d   : > { %v871_v17 = vsel %vm850_vm0, %v2506_v61, %v847_v62 }
 0x1a0   : > { %v845_v63 = vpop.permute.xlu1 %844 }
 0x1a1   : > { %v868_v16 = vsel %vm850_vm0, %v2507_v60, %v845_v63 }
 0x1a2   : > { %2389 = vmatmul.mubr.msk.bf16.gmra.mxu1 %vm914_vm1, %v868_v16 }
 0x1a3   : > { %2392 = vmatprep.mubr.msk.bf16.mxu1 %vm914_vm1, %v871_v17 }
 0x1a4   : > { %v849_v19 = vpop.permute.xlu1 %848 }
 0x1a5   : > { %v874_v20 = vsel %vm850_vm0, %v2508_v18, %v849_v19 }
 0x1aa   : > { %2393 = vmatmul.mubr.msk.bf16.gmra.mxu1 %vm914_vm1, %v874_v20 }
 0x242   : > { %v2382_v21 = vpop.f32.mrf.mxu1 }
 0x243   : > { %v974_v25 = vadd.f32 %v2382_v21, %v2013_v22 }
 0x244   : > { %v965_v23 = vpop.f32.mrf.mxu1 }
 0x245   : > { %v966_v27 = vadd.f32 %v2013_v22, %v965_v23  ;;  %v1030_v30 = vmax.f32 %v974_v25, 0.0 }
 0x246   : > { %v2383_v26 = vpop.f32.mrf.mxu1 }
 0x247   : > { %v977_v28 = vadd.f32 %v2383_v26, %v2013_v22  ;;  %v1028_v34 = vmax.f32 %v966_v27, 0.0 }
 0x248   : > { %v968_v29 = vpop.f32.mrf.mxu1 }
 0x249   : > { %v1031_v31 = vmax.f32 %v977_v28, 0.0  ;;  %v969_v33 = vadd.f32 %v2013_v22, %v968_v29 }
 0x24b   : > { %v2129_v24 = vpack.c.bf16 %v1031_v31, %v1030_v30  ;;  %v1029_v32 = vmax.f32 %v969_v33, 0.0 }
 0x24d   : > { %2161 = vst [vmem:[%s2881_s15 + $0x8] sm:$0xff] %v2129_v24   ;;  %v2124_v35 = vpack.c.bf16 %v1029_v32, %v1028_v34 }
 0x24f   : > { %2125 = vst [vmem:[%s2881_s15] sm:$0xff] %v2124_v35  }
 0x252   : > { %v2386_v36 = vpop.f32.mrf.mxu1 }
 0x253   : > { %v990_v38 = vadd.f32 %v2386_v36, %v2013_v22 }
 0x254   : > { %v981_v37 = vpop.f32.mrf.mxu1 }
 0x255   : > { %v982_v40 = vadd.f32 %v2013_v22, %v981_v37  ;;  %v1034_v43 = vmax.f32 %v990_v38, 0.0 }
 0x256   : > { %v2387_v39 = vpop.f32.mrf.mxu1 }
 0x257   : > { %v993_v41 = vadd.f32 %v2387_v39, %v2013_v22  ;;  %v1032_v46 = vmax.f32 %v982_v40, 0.0 }
 0x258   : > { %v984_v42 = vpop.f32.mrf.mxu1 }
 0x259   : > { %v1035_v44 = vmax.f32 %v993_v41, 0.0  ;;  %v985_v45 = vadd.f32 %v2013_v22, %v984_v42 }
 0x25b   : > { %v2139_v47 = vpack.c.bf16 %v1035_v44, %v1034_v43  ;;  %v1033_v48 = vmax.f32 %v985_v45, 0.0 }
 0x25d   : > { %2163 = vst [vmem:[%s2881_s15 + $0x18] sm:$0xff] %v2139_v47   ;;  %v2134_v49 = vpack.c.bf16 %v1033_v48, %v1032_v46 }
 0x25f   : > { %2162 = vst [vmem:[%s2881_s15 + $0x10] sm:$0xff] %v2134_v49  }
 0x262   : > { %v2390_v50 = vpop.f32.mrf.mxu1 }
 0x263   : > { %v1006_v52 = vadd.f32 %v2390_v50, %v2013_v22 }
 0x264   : > { %v997_v51 = vpop.f32.mrf.mxu1 }
 0x265   : > { %v998_v54 = vadd.f32 %v2013_v22, %v997_v51  ;;  %v1038_v57 = vmax.f32 %v1006_v52, 0.0 }
 0x266   : > { %v2391_v53 = vpop.f32.mrf.mxu1 }
 0x267   : > { %v1009_v55 = vadd.f32 %v2391_v53, %v2013_v22  ;;  %v1036_v61 = vmax.f32 %v998_v54, 0.0 }
 0x268   : > { %v1000_v56 = vpop.f32.mrf.mxu1 }
 0x269   : > { %v1039_v58 = vmax.f32 %v1009_v55, 0.0  ;;  %v1001_v59 = vadd.f32 %v2013_v22, %v1000_v56 }
 0x26a   : > { %v2394_v60 = vpop.f32.mrf.mxu1 }
 0x26b   : > { %v2149_v62 = vpack.c.bf16 %v1039_v58, %v1038_v57  ;;  %v1037_v63 = vmax.f32 %v1001_v59, 0.0  ;;  %v1022_v18 = vadd.f32 %v2394_v60, %v2013_v22 }
 0x26c   : > { %v1013_v16 = vpop.f32.mrf.mxu1 }
 0x26d   : > { %2165 = vst [vmem:[%s2881_s15 + $0x28] sm:$0xff] %v2149_v62   ;;  %v2144_v17 = vpack.c.bf16 %v1037_v63, %v1036_v61  ;;  %v1014_v20 = vadd.f32 %v2013_v22, %v1013_v16  ;;  %v1042_v25 = vmax.f32 %v1022_v18, 0.0 }
 0x26e   : > { %v2395_v19 = vpop.f32.mrf.mxu1 }
 0x26f   : > { %2164 = vst [vmem:[%s2881_s15 + $0x20] sm:$0xff] %v2144_v17   ;;  %v1025_v21 = vadd.f32 %v2395_v19, %v2013_v22  ;;  %v1040_v28 = vmax.f32 %v1014_v20, 0.0 }
 0x270   : > { %v1016_v23 = vpop.f32.mrf.mxu1 }
 0x271   : > { %v1043_v26 = vmax.f32 %v1025_v21, 0.0  ;;  %v1017_v27 = vadd.f32 %v2013_v22, %v1016_v23 }
 0x273   : > { %v2159_v29 = vpack.c.bf16 %v1043_v26, %v1042_v25  ;;  %v1041_v30 = vmax.f32 %v1017_v27, 0.0 }
 0x275   : > { %2167 = vst [vmem:[%s2881_s15 + $0x38] sm:$0xff] %v2159_v29   ;;  %v2154_v31 = vpack.c.bf16 %v1041_v30, %v1040_v28 }
 0x277   : > { %2166 = vst [vmem:[%s2881_s15 + $0x30] sm:$0xff] %v2154_v31  }
 0x278 PF: > { %p2043_p7 = scmp.ne.s32.totalorder %s2601_s25, 1 }
 0x279   : > { %s1547_s18 = sshra.s32 (!%p2043_p7), %s1970_s9, 3 }
 0x27a   : > { %1129 = sbr.rel (%p2043_p7) target bundleno = 1139 (0x473), region = 56  ;;  %s2076_s20 = sshll.u32 (!%p2043_p7), %s1547_s18, 2 }
 0x27b   : > { %s2974_s21 = scalar_lea.vmem (!%p2043_p7), [#allocation2], %s2076_s20 }
 0x27f   : > { %v2511_v33 = vld [vmem:[#allocation2 + $0x78] sm:$0xff]   ;;  %v2617_v24 = vmov 0   ;;  %v2513_v32 = vld [vmem:[#allocation2 + $0x70] sm:$0xff]   ;;  %v2515_v35 = vld [vmem:[#allocation2 + $0x68] sm:$0xff]   ;;  %vm1855_vm2 = vcmask 64512  }
 0x280   : > { %v2512_v34 = vld [vmem:[#allocation2 + $0x38] sm:$0xff]   ;;  %2509 = vset.pattern.permute.xlu0 %v2617_v24  ;;  %2510 = vset.pattern.permute.xlu1 %v2617_v24  ;;  %v2514_v22 = vld [vmem:[#allocation2 + $0x30] sm:$0xff]   ;;  %v2516_v36 = vld [vmem:[#allocation2 + $0x28] sm:$0xff]  }
 0x281   : > { %2244 = vmatprep.subr.bf16.mxu0 %v2511_v33  ;;  %1453 = vperm.xlu0 %2509, %v2707_v0   ;;  %v2517_v37 = vld [vmem:[#allocation2 + $0x60] sm:$0xff]   ;;  %v2519_v0 = vld [vmem:[#allocation2 + $0x58] sm:$0xff]   ;;  %v2561_v57 = vld [vmem:[%s3057_s5 + $0x50] sm:$0xff]  }
 0x282   : > { %2245 = vmatpush3.bf16.msra.mxu0 %v2512_v34  ;;  %1463 = vperm.xlu1 %2510, %v2711_v2   ;;  %v2518_v38 = vld [vmem:[#allocation2 + $0x20] sm:$0xff]   ;;  %v2520_v2 = vld [vmem:[#allocation2 + $0x18] sm:$0xff]   ;;  %v2562_v58 = vld [vmem:[%s3057_s5 + $0x10] sm:$0xff]  }
 0x283   : > { %2246 = vmatprep.subr.bf16.mxu0 %v2513_v32  ;;  %v2529_v39 = vld [vmem:[%s2697_s13 + $0x4] ss:$8 sps:$4 sm:$0xff]   ;;  %v2527_v40 = vld [vmem:[%s2697_s13] ss:$8 sps:$4 sm:$0xff]   ;;  %v2532_v42 = vld [vmem:[%s2697_s13 + $0x10] ss:$8 sps:$4 sm:$0xff]  }
 0x284   : > { %1386 = vmatprep.mubr.bf16.mxu0 %v2529_v39  ;;  %v2557_v41 = vld [vmem:[%s3057_s5 + $0x60] sm:$0xff]   ;;  %v2559_v44 = vld [vmem:[%s3057_s5 + $0x58] sm:$0xff]   ;;  %v2563_v59 = vld [vmem:[%s3057_s5 + $0x48] sm:$0xff]  }
 0x285   : > { %1458 = vperm.xlu0 %2509, %v2709_v1   ;;  %v2521_v1 = vld [vmem:[#allocation2 + $0x50] sm:$0xff]   ;;  %v2533_v43 = vld [vmem:[%s2697_s13 + $0x24] ss:$8 sps:$4 sm:$0xff]   ;;  %v2560_v45 = vld [vmem:[%s3057_s5 + $0x18] sm:$0xff]  }
 0x286   : > { %2247 = vmatpush3.bf16.msra.mxu0 %v2514_v22  ;;  %1468 = vperm.xlu1 %2510, %v2713_v3   ;;  %v2522_v3 = vld [vmem:[#allocation2 + $0x10] sm:$0xff]   ;;  %v2535_v46 = vld [vmem:[%s2697_s13 + $0x20] ss:$8 sps:$4 sm:$0xff]   ;;  %v2539_v49 = vld [vmem:[%s2697_s13 + $0x44] ss:$8 sps:$4 sm:$0xff]  }
 0x287   : > { %2248 = vmatprep.subr.bf16.mxu0 %v2515_v35  ;;  %v2536_v47 = vld [vmem:[%s2697_s13 + $0x34] ss:$8 sps:$4 sm:$0xff]   ;;  %v2538_v48 = vld [vmem:[%s2697_s13 + $0x30] ss:$8 sps:$4 sm:$0xff]   ;;  %v2541_v50 = vld [vmem:[%s2697_s13 + $0x40] ss:$8 sps:$4 sm:$0xff]  }
 0x288   : > { %v2542_v51 = vld [vmem:[%s2697_s13 + $0x54] ss:$8 sps:$4 sm:$0xff]   ;;  %v2544_v52 = vld [vmem:[%s2697_s13 + $0x50] ss:$8 sps:$4 sm:$0xff]   ;;  %v2545_v53 = vld [vmem:[%s2697_s13 + $0x64] ss:$8 sps:$4 sm:$0xff]  }
 0x289   : > { %1473 = vperm.xlu0 %2509, %v2715_v4   ;;  %v2523_v4 = vld [vmem:[#allocation2 + $0x48] sm:$0xff]   ;;  %v2548_v55 = vld [vmem:[%s2697_s13 + $0x74] ss:$8 sps:$4 sm:$0xff]   ;;  %v2550_v56 = vld [vmem:[%s2697_s13 + $0x70] ss:$8 sps:$4 sm:$0xff]  }
 0x28a   : > { %2249 = vmatpush3.bf16.msra.mxu0 %v2516_v36  ;;  %1478 = vperm.xlu1 %2510, %v2717_v5   ;;  %v2524_v5 = vld [vmem:[#allocation2 + $0x8] sm:$0xff]   ;;  %v2565_v61 = vld [vmem:[%s3057_s5 + $0x40] sm:$0xff]  }
 0x28b   : > { %2250 = vmatprep.subr.bf16.mxu0 %v2517_v37  ;;  %v2547_v54 = vld [vmem:[%s2697_s13 + $0x60] ss:$8 sps:$4 sm:$0xff]  }
 0x28c   : > { %v2564_v60 = vld [vmem:[%s3057_s5 + $0x8] sm:$0xff]   ;;  %v2566_v62 = vld [vmem:[%s3057_s5] sm:$0xff]  }
 0x28d   : > { %1483 = vperm.xlu0 %2509, %v2719_v6   ;;  %v2525_v6 = vld [vmem:[#allocation2 + $0x40] sm:$0xff]  }
 0x28e   : > { %2251 = vmatpush3.bf16.msra.mxu0 %v2518_v38  ;;  %1488 = vperm.xlu1 %2510, %v2721_v7   ;;  %v2526_v7 = vld [vmem:[#allocation2] sm:$0xff]  }
 0x28f   : > { %2252 = vmatprep.subr.bf16.mxu0 %v2519_v0  ;;  %v2567_v30 = vld [vmem:[%s2974_s21] sm:$0xff]   ;;  %v2568_v0 = vld [vmem:[%s2974_s21 + $0x8] sm:$0xff]  }
 0x291   : > { %1493 = vperm.xlu0 %2509, %v2723_v8   ;;  %v2551_v8 = vld [vmem:[%s3057_s5 + $0x78] sm:$0xff]  }
 0x292   : > { %2253 = vmatpush3.bf16.msra.mxu0 %v2520_v2  ;;  %1498 = vperm.xlu1 %2510, %v2725_v9   ;;  %v2552_v9 = vld [vmem:[%s3057_s5 + $0x38] sm:$0xff]  }
 0x293   : > { %2254 = vmatprep.subr.bf16.mxu0 %v2521_v1  ;;  %2308 = vmatprep.subr.bf16.mxu1 %v2551_v8 }
 0x294   : > { %2309 = vmatpush3.bf16.msra.mxu1 %v2552_v9 }
 0x295   : > { %1503 = vperm.xlu0 %2509, %v2727_v10   ;;  %v2530_v10 = vld [vmem:[%s2697_s13 + $0x14] ss:$8 sps:$4 sm:$0xff]  }
 0x296   : > { %2255 = vmatpush3.bf16.msra.mxu0 %v2522_v3  ;;  %1508 = vperm.xlu1 %2510, %v2729_v11   ;;  %v2553_v11 = vld [vmem:[%s3057_s5 + $0x70] sm:$0xff]  }
 0x297   : > { %2256 = vmatprep.subr.bf16.mxu0 %v2523_v4  ;;  %2310 = vmatprep.subr.bf16.mxu1 %v2553_v11 }
 0x299   : > { %1513 = vperm.xlu0 %2509, %v2731_v12   ;;  %v2554_v12 = vld [vmem:[%s3057_s5 + $0x30] sm:$0xff]  }
 0x29a   : > { %2257 = vmatpush3.bf16.msra.mxu0 %v2524_v5  ;;  %1518 = vperm.xlu1 %2510, %v2733_v13   ;;  %v2555_v13 = vld [vmem:[%s3057_s5 + $0x68] sm:$0xff]  }
 0x29b   : > { %2258 = vmatprep.subr.bf16.mxu0 %v2525_v6  ;;  %2311 = vmatpush3.bf16.msra.mxu1 %v2554_v12 }
 0x29c   : > { %2312 = vmatprep.subr.bf16.mxu1 %v2555_v13 }
 0x29d   : > { %1523 = vperm.xlu0 %2509, %v2735_v14   ;;  %v2556_v14 = vld [vmem:[%s3057_s5 + $0x28] sm:$0xff]  }
 0x29e   : > { %2259 = vmatpush3.bf16.msra.mxu0 %v2526_v7  ;;  %1528 = vperm.xlu1 %2510, %v2737_v15   ;;  %v2558_v15 = vld [vmem:[%s3057_s5 + $0x20] sm:$0xff]  }
 0x29f   : > { %2313 = vmatpush3.bf16.msra.mxu1 %v2556_v14 }
 0x2a0   : > { %2314 = vmatprep.subr.bf16.mxu1 %v2557_v41 }
 0x2a1   : > { %1387 = vmatmul.mubr.bf16.vlgmr.msra.gmra.mxu0 %v2527_v40 }
 0x2a2   : > { %1394 = vmatprep.mubr.bf16.mxu0 %v2530_v10  ;;  %v2569_v10 = vld [vmem:[%s2974_s21 + $0x10] sm:$0xff]  }
 0x2a3   : > { %2315 = vmatpush3.bf16.msra.mxu1 %v2558_v15 }
 0x2a4   : > { %2316 = vmatprep.subr.bf16.mxu1 %v2559_v44 }
 0x2a7   : > { %2317 = vmatpush3.bf16.msra.mxu1 %v2560_v45 }
 0x2a8   : > { %2318 = vmatprep.subr.bf16.mxu1 %v2561_v57 }
 0x2a9   : > { %1395 = vmatmul.mubr.bf16.gmra.mxu0 %v2532_v42 }
 0x2aa   : > { %1402 = vmatprep.mubr.bf16.mxu0 %v2533_v43 }
 0x2ab   : > { %2319 = vmatpush3.bf16.msra.mxu1 %v2562_v58 }
 0x2ac   : > { %2320 = vmatprep.subr.bf16.mxu1 %v2563_v59  ;;  %v2571_v59 = vld [vmem:[%s2974_s21 + $0x20] sm:$0xff]  }
 0x2af   : > { %2321 = vmatpush3.bf16.msra.mxu1 %v2564_v60 }
 0x2b0   : > { %2322 = vmatprep.subr.bf16.mxu1 %v2565_v61 }
 0x2b1   : > { %1403 = vmatmul.mubr.bf16.gmra.mxu0 %v2535_v46 }
 0x2b2   : > { %1410 = vmatprep.mubr.bf16.mxu0 %v2536_v47  ;;  %v2570_v47 = vld [vmem:[%s2974_s21 + $0x18] sm:$0xff]  }
 0x2b3   : > { %2323 = vmatpush3.bf16.msra.mxu1 %v2566_v62 }
 0x2b9   : > { %1411 = vmatmul.mubr.bf16.gmra.mxu0 %v2538_v48 }
 0x2ba   : > { %1418 = vmatprep.mubr.bf16.mxu0 %v2539_v49 }
 0x2c1   : > { %1419 = vmatmul.mubr.bf16.gmra.mxu0 %v2541_v50 }
 0x2c2   : > { %1426 = vmatprep.mubr.bf16.mxu0 %v2542_v51 }
 0x2c9   : > { %1427 = vmatmul.mubr.bf16.gmra.mxu0 %v2544_v52 }
 0x2ca   : > { %1434 = vmatprep.mubr.bf16.mxu0 %v2545_v53 }
 0x2d1   : > { %1435 = vmatmul.mubr.bf16.gmra.mxu0 %v2547_v54 }
 0x2d2   : > { %1442 = vmatprep.mubr.bf16.mxu0 %v2548_v55 }
 0x2d9   : > { %1443 = vmatmul.mubr.bf16.gmra.mxu0 %v2550_v56 }
 0x2fc   : > { %v1454_v16 = vpop.permute.xlu0 %1453 }
 0x2fd   : > { %v1464_v28 = vpop.permute.xlu1 %1463 }
 0x300   : > { %v1459_v23 = vpop.permute.xlu0 %1458 }
 0x301   : > { %v1469_v22 = vpop.permute.xlu1 %1468 }
 0x304   : > { %v1474_v4 = vpop.permute.xlu0 %1473 }
 0x305   : > { %v1479_v6 = vpop.permute.xlu1 %1478 }
 0x308   : > { %v1484_v41 = vpop.permute.xlu0 %1483 }
 0x309   : > { %v1489_v15 = vpop.permute.xlu1 %1488 }
 0x30c   : > { %v1494_v52 = vpop.permute.xlu0 %1493 }
 0x30d   : > { %v1499_v54 = vpop.permute.xlu1 %1498 }
 0x361   : > { %v2260_v63 = vpop.f32.mrf.mxu0 }
 0x363   : > { %v2261_v17 = vpop.f32.mrf.mxu0 }
 0x364   : > { %v2262_v19 = vadd.f32 %v2261_v17, %v2260_v63 }
 0x365   : > { %v2263_v18 = vpop.f32.mrf.mxu0 }
 0x366   : > { %v1531_v26 = vmul.f32 %v2262_v19, %v1454_v16  ;;  %v1504_v16 = vpop.permute.xlu0 %1503 }
 0x367   : > { %v2264_v20 = vpop.f32.mrf.mxu0 }
 0x368   : > { %v2265_v21 = vadd.f32 %v2264_v20, %v2263_v18  ;;  %v1509_v18 = vpop.permute.xlu1 %1508 }
 0x369   : > { %v2266_v25 = vpop.f32.mrf.mxu0 }
 0x36a   : > { %v1532_v27 = vmul.f32 %v2265_v21, %v1459_v23 }
 0x36b   : > { %v2267_v29 = vpop.f32.mrf.mxu0 }
 0x36c   : > { %v1567_v31 = vpack.c.bf16 %v1532_v27, %v1531_v26  ;;  %v2268_v34 = vadd.f32 %v2267_v29, %v2266_v25  ;;  %v2572_v25 = vld [vmem:[%s2974_s21 + $0x28] sm:$0xff]  }
 0x36d   : > { %v2269_v33 = vpop.f32.mrf.mxu0 }
 0x36e   : > { %1790 = vmatprep.mubr.bf16.mxu1 %v1567_v31  ;;  %v1533_v36 = vmul.f32 %v2268_v34, %v1464_v28 }
 0x36f   : > { %v2270_v24 = vpop.f32.mrf.mxu0  ;;  %1791 = vmatmul.mubr.bf16.vlgmr.msra.gmra.mxu1 %v2567_v30  ;;  %v1514_v30 = vpop.permute.xlu0 %1513 }
 0x370   : > { %v2271_v32 = vadd.f32 %v2270_v24, %v2269_v33  ;;  %v1519_v33 = vpop.permute.xlu1 %1518 }
 0x371   : > { %v2272_v35 = vpop.f32.mrf.mxu0 }
 0x372   : > { %v1534_v37 = vmul.f32 %v2271_v32, %v1469_v22 }
 0x373   : > { %v2273_v38 = vpop.f32.mrf.mxu0 }
 0x374   : > { %v1568_v2 = vpack.c.bf16 %v1534_v37, %v1533_v36  ;;  %v2274_v39 = vadd.f32 %v2273_v38, %v2272_v35  ;;  %v2573_v35 = vld [vmem:[%s2974_s21 + $0x30] sm:$0xff]  }
 0x375   : > { %v2275_v1 = vpop.f32.mrf.mxu0 }
 0x376   : > { %1798 = vmatprep.mubr.bf16.mxu1 %v1568_v2  ;;  %v1535_v8 = vmul.f32 %v2274_v39, %v1474_v4  ;;  %v1529_v39 = vpop.permute.xlu1 %1528 }
 0x377   : > { %v2276_v3 = vpop.f32.mrf.mxu0  ;;  %1799 = vmatmul.mubr.bf16.gmra.mxu1 %v2568_v0 }
 0x378   : > { %v2277_v5 = vadd.f32 %v2276_v3, %v2275_v1  ;;  %v1524_v1 = vpop.permute.xlu0 %1523 }
 0x379   : > { %v2278_v7 = vpop.f32.mrf.mxu0 }
 0x37a   : > { %v1536_v40 = vmul.f32 %v2277_v5, %v1479_v6  ;;  %v2574_v5 = vld [vmem:[%s2974_s21 + $0x38] sm:$0xff]  }
 0x37b   : > { %v2279_v9 = vpop.f32.mrf.mxu0 }
 0x37c   : > { %v1569_v11 = vpack.c.bf16 %v1536_v40, %v1535_v8  ;;  %v2280_v13 = vadd.f32 %v2279_v9, %v2278_v7  ;;  %v2987_v8 = vld [vmem:[%s3058_s6] ss:$0 sm:$0xff] }
 0x37d   : > { %v2281_v12 = vpop.f32.mrf.mxu0 }
 0x37e   : > { %1806 = vmatprep.mubr.bf16.mxu1 %v1569_v11  ;;  %v1537_v44 = vmul.f32 %v2280_v13, %v1484_v41 }
 0x37f   : > { %v2282_v14 = vpop.f32.mrf.mxu0  ;;  %1807 = vmatmul.mubr.bf16.gmra.mxu1 %v2569_v10 }
 0x380   : > { %v2283_v42 = vadd.f32 %v2282_v14, %v2281_v12 }
 0x381   : > { %v2284_v43 = vpop.f32.mrf.mxu0 }
 0x382   : > { %v1538_v45 = vmul.f32 %v2283_v42, %v1489_v15 }
 0x383   : > { %v2285_v46 = vpop.f32.mrf.mxu0 }
 0x384   : > { %v1570_v48 = vpack.c.bf16 %v1538_v45, %v1537_v44  ;;  %v2286_v50 = vadd.f32 %v2285_v46, %v2284_v43 }
 0x385   : > { %v2287_v49 = vpop.f32.mrf.mxu0 }
 0x386   : > { %1814 = vmatprep.mubr.bf16.mxu1 %v1570_v48  ;;  %v1539_v56 = vmul.f32 %v2286_v50, %v1494_v52 }
 0x387   : > { %v2288_v51 = vpop.f32.mrf.mxu0  ;;  %1815 = vmatmul.mubr.bf16.gmra.mxu1 %v2570_v47 }
 0x388   : > { %v2289_v53 = vadd.f32 %v2288_v51, %v2287_v49 }
 0x389   : > { %v2290_v55 = vpop.f32.mrf.mxu0 }
 0x38a   : > { %v1540_v57 = vmul.f32 %v2289_v53, %v1499_v54 }
 0x38b   : > { %v2291_v58 = vpop.f32.mrf.mxu0 }
 0x38c   : > { %v1571_v60 = vpack.c.bf16 %v1540_v57, %v1539_v56  ;;  %v2292_v62 = vadd.f32 %v2291_v58, %v2290_v55 }
 0x38d   : > { %v2293_v61 = vpop.f32.mrf.mxu0 }
 0x38e   : > { %1822 = vmatprep.mubr.bf16.mxu1 %v1571_v60  ;;  %v1541_v20 = vmul.f32 %v2292_v62, %v1504_v16 }
 0x38f   : > { %v2294_v63 = vpop.f32.mrf.mxu0  ;;  %1823 = vmatmul.mubr.bf16.gmra.mxu1 %v2571_v59 }
 0x390   : > { %v2295_v17 = vadd.f32 %v2294_v63, %v2293_v61 }
 0x391   : > { %v2296_v19 = vpop.f32.mrf.mxu0 }
 0x392   : > { %v1542_v21 = vmul.f32 %v2295_v17, %v1509_v18 }
 0x393   : > { %v2297_v23 = vpop.f32.mrf.mxu0 }
 0x394   : > { %v1572_v26 = vpack.c.bf16 %v1542_v21, %v1541_v20  ;;  %v2298_v28 = vadd.f32 %v2297_v23, %v2296_v19 }
 0x395   : > { %v2299_v27 = vpop.f32.mrf.mxu0 }
 0x396   : > { %1830 = vmatprep.mubr.bf16.mxu1 %v1572_v26  ;;  %v1543_v24 = vmul.f32 %v2298_v28, %v1514_v30 }
 0x397   : > { %v2300_v29 = vpop.f32.mrf.mxu0  ;;  %1831 = vmatmul.mubr.bf16.gmra.mxu1 %v2572_v25 }
 0x398   : > { %v2301_v31 = vadd.f32 %v2300_v29, %v2299_v27 }
 0x399   : > { %v2302_v34 = vpop.f32.mrf.mxu0 }
 0x39a   : > { %v1544_v32 = vmul.f32 %v2301_v31, %v1519_v33 }
 0x39b   : > { %v2303_v22 = vpop.f32.mrf.mxu0 }
 0x39c   : > { %v1573_v36 = vpack.c.bf16 %v1544_v32, %v1543_v24  ;;  %v2304_v38 = vadd.f32 %v2303_v22, %v2302_v34 }
 0x39d   : > { %v2305_v37 = vpop.f32.mrf.mxu0 }
 0x39e   : > { %1838 = vmatprep.mubr.bf16.mxu1 %v1573_v36  ;;  %v1545_v3 = vmul.f32 %v2304_v38, %v1524_v1 }
 0x39f   : > { %v2306_v0 = vpop.f32.mrf.mxu0  ;;  %1839 = vmatmul.mubr.bf16.gmra.mxu1 %v2573_v35 }
 0x3a0   : > { %v2307_v2 = vadd.f32 %v2306_v0, %v2305_v37 }
 0x3a2   : > { %v1546_v4 = vmul.f32 %v2307_v2, %v1529_v39 }
 0x3a4   : > { %v1574_v6 = vpack.c.bf16 %v1546_v4, %v1545_v3 }
 0x3a6   : > { %1846 = vmatprep.mubr.bf16.mxu1 %v1574_v6 }
 0x3a7   : > { %1847 = vmatmul.mubr.bf16.gmra.mxu1 %v2574_v5 }
 0x42f   : > { %v2324_v7 = vpop.f32.mrf.mxu1 }
 0x431   : > { %v2325_v40 = vpop.f32.mrf.mxu1 }
 0x432   : > { %v2326_v9 = vadd.f32 %v2325_v40, %v2324_v7 }
 0x433   : > { %v2327_v10 = vpop.f32.mrf.mxu1 }
 0x434   : > { %v1793_v11 = vadd.f32 %v2326_v9, %v2987_v8 }
 0x435   : > { %v2328_v12 = vpop.f32.mrf.mxu1 }
 0x436   : > { %1856 = vst.msk [vmem:[%s2705_s19] sm:$0xff] %vm1855_vm2, %v1793_v11  ;;  %v2329_v13 = vadd.f32 %v2328_v12, %v2327_v10 }
 0x437   : > { %v2330_v14 = vpop.f32.mrf.mxu1 }
 0x438   : > { %v1796_v41 = vadd.f32 %v2329_v13, %v2987_v8 }
 0x439   : > { %v2331_v42 = vpop.f32.mrf.mxu1 }
 0x43a   : > { %1857 = vst.msk [vmem:[%s2705_s19 + $0x8] sm:$0xff] %vm1855_vm2, %v1796_v41  ;;  %v2332_v15 = vadd.f32 %v2331_v42, %v2330_v14 }
 0x43b   : > { %v2333_v43 = vpop.f32.mrf.mxu1 }
 0x43c   : > { %v1801_v44 = vadd.f32 %v2332_v15, %v2987_v8 }
 0x43d   : > { %v2334_v45 = vpop.f32.mrf.mxu1 }
 0x43e   : > { %1858 = vst.msk [vmem:[%s2705_s19 + $0x10] sm:$0xff] %vm1855_vm2, %v1801_v44  ;;  %v2335_v46 = vadd.f32 %v2334_v45, %v2333_v43 }
 0x43f   : > { %v2336_v47 = vpop.f32.mrf.mxu1 }
 0x440   : > { %v1804_v48 = vadd.f32 %v2335_v46, %v2987_v8 }
 0x441   : > { %v2337_v49 = vpop.f32.mrf.mxu1 }
 0x442   : > { %1859 = vst.msk [vmem:[%s2705_s19 + $0x18] sm:$0xff] %vm1855_vm2, %v1804_v48  ;;  %v2338_v50 = vadd.f32 %v2337_v49, %v2336_v47 }
 0x443   : > { %v2339_v51 = vpop.f32.mrf.mxu1 }
 0x444   : > { %v1809_v52 = vadd.f32 %v2338_v50, %v2987_v8 }
 0x445   : > { %v2340_v53 = vpop.f32.mrf.mxu1 }
 0x446   : > { %1860 = vst.msk [vmem:[%s2705_s19 + $0x20] sm:$0xff] %vm1855_vm2, %v1809_v52  ;;  %v2341_v54 = vadd.f32 %v2340_v53, %v2339_v51 }
 0x447   : > { %v2342_v55 = vpop.f32.mrf.mxu1 }
 0x448   : > { %v1812_v56 = vadd.f32 %v2341_v54, %v2987_v8 }
 0x449   : > { %v2343_v57 = vpop.f32.mrf.mxu1 }
 0x44a   : > { %1861 = vst.msk [vmem:[%s2705_s19 + $0x28] sm:$0xff] %vm1855_vm2, %v1812_v56  ;;  %v2344_v58 = vadd.f32 %v2343_v57, %v2342_v55 }
 0x44b   : > { %v2345_v59 = vpop.f32.mrf.mxu1 }
 0x44c   : > { %v1817_v60 = vadd.f32 %v2344_v58, %v2987_v8 }
 0x44d   : > { %v2346_v61 = vpop.f32.mrf.mxu1 }
 0x44e   : > { %1862 = vst.msk [vmem:[%s2705_s19 + $0x30] sm:$0xff] %vm1855_vm2, %v1817_v60  ;;  %v2347_v62 = vadd.f32 %v2346_v61, %v2345_v59 }
 0x44f   : > { %v2348_v63 = vpop.f32.mrf.mxu1 }
 0x450   : > { %v1820_v16 = vadd.f32 %v2347_v62, %v2987_v8 }
 0x451   : > { %v2349_v17 = vpop.f32.mrf.mxu1 }
 0x452   : > { %1863 = vst.msk [vmem:[%s2705_s19 + $0x38] sm:$0xff] %vm1855_vm2, %v1820_v16  ;;  %v2350_v18 = vadd.f32 %v2349_v17, %v2348_v63 }
 0x453   : > { %v2351_v19 = vpop.f32.mrf.mxu1 }
 0x454   : > { %v1825_v20 = vadd.f32 %v2350_v18, %v2987_v8 }
 0x455   : > { %v2352_v21 = vpop.f32.mrf.mxu1 }
 0x456   : > { %1864 = vst.msk [vmem:[%s2705_s19 + $0x40] sm:$0xff] %vm1855_vm2, %v1825_v20  ;;  %v2353_v23 = vadd.f32 %v2352_v21, %v2351_v19 }
 0x457   : > { %v2354_v25 = vpop.f32.mrf.mxu1 }
 0x458   : > { %v1828_v26 = vadd.f32 %v2353_v23, %v2987_v8 }
 0x459   : > { %v2355_v27 = vpop.f32.mrf.mxu1 }
 0x45a   : > { %1865 = vst.msk [vmem:[%s2705_s19 + $0x48] sm:$0xff] %vm1855_vm2, %v1828_v26  ;;  %v2356_v28 = vadd.f32 %v2355_v27, %v2354_v25 }
 0x45b   : > { %v2357_v29 = vpop.f32.mrf.mxu1 }
 0x45c   : > { %v1833_v30 = vadd.f32 %v2356_v28, %v2987_v8 }
 0x45d   : > { %v2358_v31 = vpop.f32.mrf.mxu1 }
 0x45e   : > { %1866 = vst.msk [vmem:[%s2705_s19 + $0x50] sm:$0xff] %vm1855_vm2, %v1833_v30  ;;  %v2359_v33 = vadd.f32 %v2358_v31, %v2357_v29 }
 0x45f   : > { %v2360_v34 = vpop.f32.mrf.mxu1 }
 0x460   : > { %v1836_v24 = vadd.f32 %v2359_v33, %v2987_v8 }
 0x461   : > { %v2361_v32 = vpop.f32.mrf.mxu1 }
 0x462   : > { %1867 = vst.msk [vmem:[%s2705_s19 + $0x58] sm:$0xff] %vm1855_vm2, %v1836_v24  ;;  %v2362_v22 = vadd.f32 %v2361_v32, %v2360_v34 }
 0x463   : > { %v2363_v35 = vpop.f32.mrf.mxu1 }
 0x464   : > { %v1841_v36 = vadd.f32 %v2362_v22, %v2987_v8 }
 0x465   : > { %v2364_v37 = vpop.f32.mrf.mxu1 }
 0x466   : > { %1868 = vst.msk [vmem:[%s2705_s19 + $0x60] sm:$0xff] %vm1855_vm2, %v1841_v36  ;;  %v2365_v38 = vadd.f32 %v2364_v37, %v2363_v35 }
 0x467   : > { %v2366_v0 = vpop.f32.mrf.mxu1 }
 0x468   : > { %v1844_v2 = vadd.f32 %v2365_v38, %v2987_v8 }
 0x469   : > { %v2367_v1 = vpop.f32.mrf.mxu1 }
 0x46a   : > { %1869 = vst.msk [vmem:[%s2705_s19 + $0x68] sm:$0xff] %vm1855_vm2, %v1844_v2  ;;  %v2368_v39 = vadd.f32 %v2367_v1, %v2366_v0 }
 0x46b   : > { %v2369_v3 = vpop.f32.mrf.mxu1 }
 0x46c   : > { %v1849_v4 = vadd.f32 %v2368_v39, %v2987_v8 }
 0x46d   : > { %v2370_v5 = vpop.f32.mrf.mxu1 }
 0x46e   : > { %1870 = vst.msk [vmem:[%s2705_s19 + $0x70] sm:$0xff] %vm1855_vm2, %v1849_v4  ;;  %v2371_v6 = vadd.f32 %v2370_v5, %v2369_v3 }
 0x470   : > { %v1852_v7 = vadd.f32 %v2371_v6, %v2987_v8 }
 0x472   : > { %1871 = vst.msk [vmem:[%s2705_s19 + $0x78] sm:$0xff] %vm1855_vm2, %v1852_v7 }
 0x473 PF: > { %s17_s28 = sadd.s32 1, %s2613_s28   ;;  %s3060_s24 = smov %s2605_s26 }
 0x474   : > { %p14_p8 = scmp.ge.s32.totalorder %s17_s28, 6   ;;  %s3061_s25 = smov %s2609_s27 }
 0x475   : > { %s3062_s26 = smov %s3065_s29  ;;  %s3063_s27 = smov %s3069_s30 }
 0x476   :  { %16 = sbr.rel (!%p14_p8) target bundleno = 3 (0x3), region = 92 }

</bundles_post_ra>
